<compile_context>
chip_gen: v7x
topology: tpu7x:2x2x1
jax: 0.10.0
libtpu: 0.0.40
codegen_flags: <defaults>
</compile_context>

<pallas_src>
import jax
import jax.numpy as jnp
from jax.experimental import pallas as pl
from jax.experimental.pallas import tpu as pltpu

LANE = 128


def _round_up(x, m):
    return (x + m - 1) // m * m


def mlp_kernel(x_ref,
               w1_ref, b1_ref,
               w2_ref, b2_ref,
               w3_ref, b3_ref,
               w4_ref, b4_ref,
               w5_ref, b5_ref,
               o_ref):
    # One batch tile of the full 5-layer forward: matmuls on the MXU,
    # bias-add + ReLU on the VPU, all intermediates live in vregs/VMEM.
    h = jnp.dot(x_ref[...], w1_ref[...], preferred_element_type=jnp.float32)
    h = jnp.maximum(h + b1_ref[...], 0.0)

    h = jnp.dot(h, w2_ref[...], preferred_element_type=jnp.float32)
    h = jnp.maximum(h + b2_ref[...], 0.0)

    h = jnp.dot(h, w3_ref[...], preferred_element_type=jnp.float32)
    h = jnp.maximum(h + b3_ref[...], 0.0)

    h = jnp.dot(h, w4_ref[...], preferred_element_type=jnp.float32)
    h = jnp.maximum(h + b4_ref[...], 0.0)

    out = jnp.dot(h, w5_ref[...], preferred_element_type=jnp.float32)
    o_ref[...] = (out + b5_ref[...]).astype(o_ref.dtype)


def net_forward(x, params, *, tile_b=128):
    """x: [batch, n_feature]; params: list of (W [in,out], b [1,out])."""
    batch, n_feature = x.shape
    n_output = params[-1][0].shape[1]

    # --- pad everything to lane-dense / tile-aligned shapes -----------------
    f_pad = _round_up(n_feature, LANE)
    b_pad = _round_up(batch, tile_b)

    x_p = jnp.zeros((b_pad, f_pad), jnp.float32).at[:batch, :n_feature].set(x)

    padded_params = []
    in_dim = f_pad
    for (w, b) in params:
        din, dout = w.shape
        dout_p = _round_up(dout, LANE)
        w_p = jnp.zeros((in_dim, dout_p), jnp.float32).at[:din, :dout].set(w)
        b_p = jnp.zeros((1, dout_p), jnp.float32).at[:, :dout].set(b)
        padded_params.append((w_p, b_p))
        in_dim = dout_p
    o_pad = in_dim  # padded output width of the last layer

    # --- build specs / args --------------------------------------------------
    flat_args = [x_p]
    in_specs = [pl.BlockSpec((tile_b, f_pad), lambda i: (i, 0))]
    flops = 0
    bytes_accessed = x_p.size * 4 + b_pad * o_pad * 4
    for (w_p, b_p) in padded_params:
        flat_args.append(w_p)
        in_specs.append(pl.BlockSpec(w_p.shape, lambda i: (0, 0)))
        flat_args.append(b_p)
        in_specs.append(pl.BlockSpec(b_p.shape, lambda i: (0, 0)))
        flops += 2 * b_pad * w_p.shape[0] * w_p.shape[1]
        bytes_accessed += (w_p.size + b_p.size) * 4

    out_padded = pl.pallas_call(
        mlp_kernel,
        out_shape=jax.ShapeDtypeStruct((b_pad, o_pad), jnp.float32),
        grid=(b_pad // tile_b,),
        in_specs=in_specs,
        out_specs=pl.BlockSpec((tile_b, o_pad), lambda i: (i, 0)),
        compiler_params=pltpu.CompilerParams(
            dimension_semantics=("parallel",)),
        cost_estimate=pl.CostEstimate(
            flops=flops, transcendentals=0, bytes_accessed=bytes_accessed),
    )(*flat_args)

    # Strip the zero padding.
    return out_padded[:batch, :n_output]


def init_params(key, n_feature, n_hidden, n_output):
    """Deterministic init mimicking torch.nn.Linear's U(-1/sqrt(fan_in), ...)."""
    dims = [(n_feature, n_hidden),
            (n_hidden, n_hidden),
            (n_hidden, n_hidden),
            (n_hidden, n_hidden),
            (n_hidden, n_output)]
    params = []
    for (fan_in, fan_out) in dims:
        key, kw, kb = jax.random.split(key, 3)
        bound = 1.0 / jnp.sqrt(jnp.float32(fan_in))
        # PyTorch stores weight as [out, in]; draw that shape and transpose
        # so the kernel computes x @ W directly (== x @ W_torch^T).
        w_t = jax.random.uniform(kw, (fan_out, fan_in), jnp.float32,
                                 minval=-bound, maxval=bound)
        b = jax.random.uniform(kb, (1, fan_out), jnp.float32,
                               minval=-bound, maxval=bound)
        params.append((w_t.T, b))
    return params


def reference_forward(x, params):
    h = x
    for (w, b) in params[:-1]:
        h = jnp.maximum(h @ w + b, 0.0)
    w, b = params[-1]
    return h @ w + b


if __name__ == "__main__":
    key = jax.random.PRNGKey(0)
    # Model dims match the toy `Net`; batch is grown so the per-call overhead
    # is amortized across a pipelined, parallel batch grid (2 tiles of 128).
    batch, n_feature, n_hidden, n_output = 256, 4, 32, 3

    key, kx = jax.random.split(key)
    x = jax.random.normal(kx, (batch, n_feature), jnp.float32)
    params = init_params(key, n_feature, n_hidden, n_output)

    out = net_forward(x, params, tile_b=128)
    out = jax.block_until_ready(out)

    ref = reference_forward(x, params)
    assert out.shape == (batch, n_output)
    assert jnp.allclose(out, ref, atol=2e-5, rtol=2e-5)

    print("KERNEL_OK")
</pallas_src>

<mosaic_0001>
module attributes {stable_mosaic.version = 11 : i64} {
  func.func @mlp_kernel(%arg0: i32, %arg1: memref<128x128xf32, #tpu.memory_space<vmem>>, %arg2: memref<128x128xf32, #tpu.memory_space<vmem>>, %arg3: memref<1x128xf32, #tpu.memory_space<vmem>>, %arg4: memref<128x128xf32, #tpu.memory_space<vmem>>, %arg5: memref<1x128xf32, #tpu.memory_space<vmem>>, %arg6: memref<128x128xf32, #tpu.memory_space<vmem>>, %arg7: memref<1x128xf32, #tpu.memory_space<vmem>>, %arg8: memref<128x128xf32, #tpu.memory_space<vmem>>, %arg9: memref<1x128xf32, #tpu.memory_space<vmem>>, %arg10: memref<128x128xf32, #tpu.memory_space<vmem>>, %arg11: memref<1x128xf32, #tpu.memory_space<vmem>>, %arg12: memref<128x128xf32, #tpu.memory_space<vmem>>) attributes {dimension_semantics = [#tpu.dimension_semantics<parallel>], iteration_bounds = array<i64: 2>, scalar_prefetch = 0 : i64, scratch_operands = 0 : i64, tpu.core_type = #tpu.core_type<tc>, window_params = [{transform_indices = @transform_0, window_bounds = array<i64: 128, 128>}, {pipeline_mode = #tpu.pipeline_mode<synchronous>, transform_indices = @transform_1, window_bounds = array<i64: 128, 128>}, {pipeline_mode = #tpu.pipeline_mode<synchronous>, transform_indices = @transform_2, window_bounds = array<i64: 1, 128>}, {pipeline_mode = #tpu.pipeline_mode<synchronous>, transform_indices = @transform_3, window_bounds = array<i64: 128, 128>}, {pipeline_mode = #tpu.pipeline_mode<synchronous>, transform_indices = @transform_4, window_bounds = array<i64: 1, 128>}, {pipeline_mode = #tpu.pipeline_mode<synchronous>, transform_indices = @transform_5, window_bounds = array<i64: 128, 128>}, {pipeline_mode = #tpu.pipeline_mode<synchronous>, transform_indices = @transform_6, window_bounds = array<i64: 1, 128>}, {pipeline_mode = #tpu.pipeline_mode<synchronous>, transform_indices = @transform_7, window_bounds = array<i64: 128, 128>}, {pipeline_mode = #tpu.pipeline_mode<synchronous>, transform_indices = @transform_8, window_bounds = array<i64: 1, 128>}, {pipeline_mode = #tpu.pipeline_mode<synchronous>, transform_indices = @transform_9, window_bounds = array<i64: 128, 128>}, {pipeline_mode = #tpu.pipeline_mode<synchronous>, transform_indices = @transform_10, window_bounds = array<i64: 1, 128>}, {transform_indices = @transform_11, window_bounds = array<i64: 128, 128>}]} {
    %c0 = arith.constant 0 : index
    %c0_0 = arith.constant 0 : index
    %0 = vector.load %arg1[%c0, %c0_0] : memref<128x128xf32, #tpu.memory_space<vmem>>, vector<128x128xf32>
    %c0_1 = arith.constant 0 : index
    %c0_2 = arith.constant 0 : index
    %1 = vector.load %arg2[%c0_1, %c0_2] : memref<128x128xf32, #tpu.memory_space<vmem>>, vector<128x128xf32>
    %cst = arith.constant dense<0.000000e+00> : vector<128x128xf32>
    %2 = tpu.matmul %0, %1, %cst {dimension_numbers = #tpu.dot_dimension_numbers<[1], [0], [0], [1], [0, 0, 1, 1], [], []>} : vector<128x128xf32>, vector<128x128xf32>, vector<128x128xf32> -> vector<128x128xf32>
    %c0_3 = arith.constant 0 : index
    %c0_4 = arith.constant 0 : index
    %3 = vector.load %arg3[%c0_3, %c0_4] : memref<1x128xf32, #tpu.memory_space<vmem>>, vector<1x128xf32>
    %4 = vector.broadcast %3 : vector<1x128xf32> to vector<128x128xf32>
    %5 = arith.addf %2, %4 : vector<128x128xf32>
    %cst_5 = arith.constant 0.000000e+00 : f32
    %6 = vector.broadcast %cst_5 : f32 to vector<128x128xf32>
    %7 = arith.maximumf %5, %6 : vector<128x128xf32>
    %c0_6 = arith.constant 0 : index
    %c0_7 = arith.constant 0 : index
    %8 = vector.load %arg4[%c0_6, %c0_7] : memref<128x128xf32, #tpu.memory_space<vmem>>, vector<128x128xf32>
    %cst_8 = arith.constant dense<0.000000e+00> : vector<128x128xf32>
    %9 = tpu.matmul %7, %8, %cst_8 {dimension_numbers = #tpu.dot_dimension_numbers<[1], [0], [0], [1], [0, 0, 1, 1], [], []>} : vector<128x128xf32>, vector<128x128xf32>, vector<128x128xf32> -> vector<128x128xf32>
    %c0_9 = arith.constant 0 : index
    %c0_10 = arith.constant 0 : index
    %10 = vector.load %arg5[%c0_9, %c0_10] : memref<1x128xf32, #tpu.memory_space<vmem>>, vector<1x128xf32>
    %11 = vector.broadcast %10 : vector<1x128xf32> to vector<128x128xf32>
    %12 = arith.addf %9, %11 : vector<128x128xf32>
    %cst_11 = arith.constant 0.000000e+00 : f32
    %13 = vector.broadcast %cst_11 : f32 to vector<128x128xf32>
    %14 = arith.maximumf %12, %13 : vector<128x128xf32>
    %c0_12 = arith.constant 0 : index
    %c0_13 = arith.constant 0 : index
    %15 = vector.load %arg6[%c0_12, %c0_13] : memref<128x128xf32, #tpu.memory_space<vmem>>, vector<128x128xf32>
    %cst_14 = arith.constant dense<0.000000e+00> : vector<128x128xf32>
    %16 = tpu.matmul %14, %15, %cst_14 {dimension_numbers = #tpu.dot_dimension_numbers<[1], [0], [0], [1], [0, 0, 1, 1], [], []>} : vector<128x128xf32>, vector<128x128xf32>, vector<128x128xf32> -> vector<128x128xf32>
    %c0_15 = arith.constant 0 : index
    %c0_16 = arith.constant 0 : index
    %17 = vector.load %arg7[%c0_15, %c0_16] : memref<1x128xf32, #tpu.memory_space<vmem>>, vector<1x128xf32>
    %18 = vector.broadcast %17 : vector<1x128xf32> to vector<128x128xf32>
    %19 = arith.addf %16, %18 : vector<128x128xf32>
    %cst_17 = arith.constant 0.000000e+00 : f32
    %20 = vector.broadcast %cst_17 : f32 to vector<128x128xf32>
    %21 = arith.maximumf %19, %20 : vector<128x128xf32>
    %c0_18 = arith.constant 0 : index
    %c0_19 = arith.constant 0 : index
    %22 = vector.load %arg8[%c0_18, %c0_19] : memref<128x128xf32, #tpu.memory_space<vmem>>, vector<128x128xf32>
    %cst_20 = arith.constant dense<0.000000e+00> : vector<128x128xf32>
    %23 = tpu.matmul %21, %22, %cst_20 {dimension_numbers = #tpu.dot_dimension_numbers<[1], [0], [0], [1], [0, 0, 1, 1], [], []>} : vector<128x128xf32>, vector<128x128xf32>, vector<128x128xf32> -> vector<128x128xf32>
    %c0_21 = arith.constant 0 : index
    %c0_22 = arith.constant 0 : index
    %24 = vector.load %arg9[%c0_21, %c0_22] : memref<1x128xf32, #tpu.memory_space<vmem>>, vector<1x128xf32>
    %25 = vector.broadcast %24 : vector<1x128xf32> to vector<128x128xf32>
    %26 = arith.addf %23, %25 : vector<128x128xf32>
    %cst_23 = arith.constant 0.000000e+00 : f32
    %27 = vector.broadcast %cst_23 : f32 to vector<128x128xf32>
    %28 = arith.maximumf %26, %27 : vector<128x128xf32>
    %c0_24 = arith.constant 0 : index
    %c0_25 = arith.constant 0 : index
    %29 = vector.load %arg10[%c0_24, %c0_25] : memref<128x128xf32, #tpu.memory_space<vmem>>, vector<128x128xf32>
    %cst_26 = arith.constant dense<0.000000e+00> : vector<128x128xf32>
    %30 = tpu.matmul %28, %29, %cst_26 {dimension_numbers = #tpu.dot_dimension_numbers<[1], [0], [0], [1], [0, 0, 1, 1], [], []>} : vector<128x128xf32>, vector<128x128xf32>, vector<128x128xf32> -> vector<128x128xf32>
    %c0_27 = arith.constant 0 : index
    %c0_28 = arith.constant 0 : index
    %31 = vector.load %arg11[%c0_27, %c0_28] : memref<1x128xf32, #tpu.memory_space<vmem>>, vector<1x128xf32>
    %32 = vector.broadcast %31 : vector<1x128xf32> to vector<128x128xf32>
    %33 = arith.addf %30, %32 : vector<128x128xf32>
    %c0_29 = arith.constant 0 : index
    %c0_30 = arith.constant 0 : index
    %34 = vector.load %arg12[%c0_29, %c0_30] : memref<128x128xf32, #tpu.memory_space<vmem>>, vector<128x128xf32>
    tpu.vector_store %arg12[%c0_29, %c0_30], %33 {strides = array<i32>} : memref<128x128xf32, #tpu.memory_space<vmem>>, vector<128x128xf32>,
    return
  }
  func.func @transform_0(%arg0: i32) -> (i32, i32) {
    %c0_i32 = arith.constant 0 : i32
    %c0_i32_0 = arith.constant 0 : i32
    return %arg0, %c0_i32 : i32, i32
  }
  func.func @transform_1(%arg0: i32) -> (i32, i32) {
    %c0_i32 = arith.constant 0 : i32
    %c0_i32_0 = arith.constant 0 : i32
    %c0_i32_1 = arith.constant 0 : i32
    return %c0_i32, %c0_i32_0 : i32, i32
  }
  func.func @transform_2(%arg0: i32) -> (i32, i32) {
    %c0_i32 = arith.constant 0 : i32
    %c0_i32_0 = arith.constant 0 : i32
    %c0_i32_1 = arith.constant 0 : i32
    return %c0_i32, %c0_i32_0 : i32, i32
  }
  func.func @transform_3(%arg0: i32) -> (i32, i32) {
    %c0_i32 = arith.constant 0 : i32
    %c0_i32_0 = arith.constant 0 : i32
    %c0_i32_1 = arith.constant 0 : i32
    return %c0_i32, %c0_i32_0 : i32, i32
  }
  func.func @transform_4(%arg0: i32) -> (i32, i32) {
    %c0_i32 = arith.constant 0 : i32
    %c0_i32_0 = arith.constant 0 : i32
    %c0_i32_1 = arith.constant 0 : i32
    return %c0_i32, %c0_i32_0 : i32, i32
  }
  func.func @transform_5(%arg0: i32) -> (i32, i32) {
    %c0_i32 = arith.constant 0 : i32
    %c0_i32_0 = arith.constant 0 : i32
    %c0_i32_1 = arith.constant 0 : i32
    return %c0_i32, %c0_i32_0 : i32, i32
  }
  func.func @transform_6(%arg0: i32) -> (i32, i32) {
    %c0_i32 = arith.constant 0 : i32
    %c0_i32_0 = arith.constant 0 : i32
    %c0_i32_1 = arith.constant 0 : i32
    return %c0_i32, %c0_i32_0 : i32, i32
  }
  func.func @transform_7(%arg0: i32) -> (i32, i32) {
    %c0_i32 = arith.constant 0 : i32
    %c0_i32_0 = arith.constant 0 : i32
    %c0_i32_1 = arith.constant 0 : i32
    return %c0_i32, %c0_i32_0 : i32, i32
  }
  func.func @transform_8(%arg0: i32) -> (i32, i32) {
    %c0_i32 = arith.constant 0 : i32
    %c0_i32_0 = arith.constant 0 : i32
    %c0_i32_1 = arith.constant 0 : i32
    return %c0_i32, %c0_i32_0 : i32, i32
  }
  func.func @transform_9(%arg0: i32) -> (i32, i32) {
    %c0_i32 = arith.constant 0 : i32
    %c0_i32_0 = arith.constant 0 : i32
    %c0_i32_1 = arith.constant 0 : i32
    return %c0_i32, %c0_i32_0 : i32, i32
  }
  func.func @transform_10(%arg0: i32) -> (i32, i32) {
    %c0_i32 = arith.constant 0 : i32
    %c0_i32_0 = arith.constant 0 : i32
    %c0_i32_1 = arith.constant 0 : i32
    return %c0_i32, %c0_i32_0 : i32, i32
  }
  func.func @transform_11(%arg0: i32) -> (i32, i32) {
    %c0_i32 = arith.constant 0 : i32
    %c0_i32_0 = arith.constant 0 : i32
    return %arg0, %c0_i32 : i32, i32
  }
}

</mosaic_0001>

<bundles_post_ra>
// kernel: tpu_custom_call.1
= control target key start
LH: loop header
LB: loop body
LE: loop exit
PB: predicated region body
PF: predicated region fallthrough
CT: control target
= control target key end

     0   :  { %s3037_s0 = inlined_call_operand.hbm [shape: f32[256,128], index: 0, kind: input, shape index: {}]   ;;  %s3038_s1 = inlined_call_operand.hbm [shape: f32[128,128], index: 1, kind: input, shape index: {}]   ;;  %s3039_s2 = inlined_call_operand.vmem [shape: f32[1,128], index: 2, kind: input, shape index: {}]   ;;  %s3040_s3 = inlined_call_operand.hbm [shape: f32[128,128], index: 3, kind: input, shape index: {}]   ;;  %s3041_s4 = inlined_call_operand.vmem [shape: f32[1,128], index: 4, kind: input, shape index: {}]   ;;  %s3042_s5 = inlined_call_operand.hbm [shape: f32[128,128], index: 5, kind: input, shape index: {}]   ;;  %s3043_s6 = inlined_call_operand.vmem [shape: f32[1,128], index: 6, kind: input, shape index: {}]   ;;  %s3044_s7 = inlined_call_operand.hbm [shape: f32[128,128], index: 7, kind: input, shape index: {}]   ;;  %s3045_s8 = inlined_call_operand.vmem [shape: f32[1,128], index: 8, kind: input, shape index: {}]   ;;  %s3046_s9 = inlined_call_operand.hbm [shape: f32[128,128], index: 9, kind: input, shape index: {}]   ;;  %s3047_s10 = inlined_call_operand.vmem [shape: f32[1,128], index: 10, kind: input, shape index: {}]   ;;  %s3048_s11 = inlined_call_operand.hbm [shape: f32[256,128], index: 11, kind: output, shape index: {}]  }
   0x1   :  { %3054 = sst [smem:[#allocation19_spill]] %s3038_s1 }
   0x2   :  { %3055 = sst [smem:[#allocation20_spill]] %s3045_s8 }
   0x3   :  { %3056 = sst [smem:[#allocation21_spill]] %s3047_s10 }
   0x4   :  { %3057 = sst [smem:[#allocation22_spill]] %s3048_s11 }
   0x5   :  { %16 = vsyncpa [#allocation3], 0 }
   0x6   :  { %18 = vsyncpa [#allocation3 + $0x1], 0 }
   0x7   :  { %19 = vsyncpa [#allocation6], 0 }
   0x8   :  { %20 = vsyncpa [#allocation9], 0 }
   0x9   :  { %21 = vsyncpa [#allocation12], 0 }
   0xa   :  { %22 = vsyncpa [#allocation4], 0 }
   0xb   :  { %24 = vsyncpa [#allocation4 + $0x1], 0  ;;  %s2620_s17 = smov 0   ;;  %s2622_s18 = smov 0  }
   0xc   :  { %s2624_s19 = smov 0   ;;  %s2626_s20 = smov 0  }
   0xd LB: > { %s2549_s21 = smov [#allocation5]   ;;  %s2641_s23 = sadd.s32 4294967295, %s2547_s20   ;;  %s2547_s20 = sphi %s2626_s20, %s3084_s20   ;;  %s2543_s19 = sphi %s2624_s19, %s3083_s19   ;;  %s2539_s18 = sphi %s2622_s18, %s3082_s18   ;;  %s2535_s17 = sphi %s2620_s17, %s3081_s17  }
   0xe   : > { %s309_s22 = sshll.u32 %s2549_s21, 4  ;;  %p1552_p0 = scmp.ge.s32.totalorder %s2547_s20, 1  ;;  %s2646_s22 = int_to_ptr.vmem [resolvable:$true] %s309_s22 }
   0xf   : > { %p3050_p1 = scmp.eq.s32.totalorder %s2641_s23, 0  ;;  %p297_p2 = scmp.lt.s32.totalorder %s2547_s20, 3 }
  0x10   : > { %s2550_s25 = smov [#allocation8]   ;;  %s2551_s28 = smov [#allocation7]  }
  0x11   : > { %p2648_p3 = pnand %p1552_p0, %p297_p2  ;;  %s341_s26 = sshll.u32 %s2550_s25, 4  ;;  %s2661_s26 = int_to_ptr.vmem [resolvable:$true] %s341_s26 }
  0x12   : > { %s325_s29 = sshll.u32 %s2551_s28, 4  ;;  %s3060_s1 = sld [smem:[#allocation19_spill]]  ;;  %s2663_s29 = int_to_ptr.vmem [resolvable:$true] %s325_s29 }
  0x13   : > { %s3058_s24 = scalar_select %p2648_p3, 1, 0 }
  0x14   : > { %p2222_p5 = pneg %p2648_p3 }
  0x16   : > { %p2657_p6 = pnand %p2222_p5, %p3050_p1 }
  0x18   : > { %s2299_s13 = scalar_lea.hbm %s3060_s1, 2048  ;;  %p2673_p8 = pneg %p2657_p6 }
  0x19   : > { %p2300_p7 = scmp.ne.s32.totalorder %s3060_s1, %s2299_s13  ;;  %p2306_p11 = scmp.lt.u32.totalorder %s2299_s13, %s3060_s1 }
  0x1b   : > { %p2302_p9 = pnand %p2673_p8, %p2300_p7 }
  0x1d   : > { %p2303_p10 = pneg %p2302_p9 }
  0x1f   : > { %p2308_p12 = pnand %p2306_p11, %p2303_p10 }
  0x21   : > { %2311 = shalt.err (!%p2308_p12)
}
  0x22   : > { %s2312_s28 = scalar_lea.vmem %s2646_s22, 2048  ;;  %p2320_p5 = scmp.lt.s32.totalorder %s2646_s22, %s2646_s22 }
  0x23   : > { %p2313_p13 = scmp.ne.s32.totalorder %s2646_s22, %s2312_s28  ;;  %p2321_p4 = scmp.lt.s32.totalorder %s2312_s28, %s2312_s28 }
  0x25   : > { %p2315_p0 = pnand %p2313_p13, %p2673_p8  ;;  %p2322_p7 = por %p2321_p4, %p2320_p5 }
  0x27   : > { %p2316_p2 = pneg %p2315_p0 }
  0x29   : > { %p2323_p9 = pnand %p2322_p7, %p2316_p2 }
  0x2b   : > { %2326 = shalt.err (!%p2323_p9)
}
  0x2c   : > { %s3052_s30 = smov 128   ;;  %s2553_s12 = smov 8  }
  0x2d   : > { %2225 = dma.hbm_to_vmem [thread:$0]  (!%p2657_p6), %s3060_s1, 2048, %s2646_s22, [#allocation6], %s3052_s30, %s3052_s30, %s2553_s12  }
  0x2e   : > { %s2327_s25 = scalar_lea.hbm %s3042_s5, 2048 }
  0x2f   : > { %p2328_p4 = scmp.ne.s32.totalorder %s3042_s5, %s2327_s25  ;;  %p2334_p12 = scmp.lt.u32.totalorder %s2327_s25, %s3042_s5 }
  0x31   : > { %p2330_p10 = pnand %p2328_p4, %p2673_p8 }
  0x33   : > { %p2331_p11 = pneg %p2330_p10 }
  0x35   : > { %p2336_p13 = pnand %p2334_p12, %p2331_p11 }
  0x37   : > { %2339 = shalt.err (!%p2336_p13)
}
  0x38   : > { %s2340_s22 = scalar_lea.vmem %s2661_s26, 2048  ;;  %p2348_p7 = scmp.lt.s32.totalorder %s2661_s26, %s2661_s26 }
  0x39   : > { %p2341_p0 = scmp.ne.s32.totalorder %s2661_s26, %s2340_s22  ;;  %p2349_p9 = scmp.lt.s32.totalorder %s2340_s22, %s2340_s22 }
  0x3b   : > { %p2343_p2 = pnand %p2341_p0, %p2673_p8  ;;  %p2350_p4 = por %p2349_p9, %p2348_p7 }
  0x3d   : > { %p2344_p5 = pneg %p2343_p2 }
  0x3f   : > { %p2351_p10 = pnand %p2350_p4, %p2344_p5 }
  0x41   : > { %2354 = shalt.err (!%p2351_p10)
}
  0x42   : > { %2231 = dma.hbm_to_vmem [thread:$0]  (!%p2657_p6), %s3042_s5, 2048, %s2661_s26, [#allocation9], %s3052_s30, %s3052_s30, %s2553_s12  }
  0x43   : > { %s2355_s14 = scalar_lea.hbm %s3040_s3, 2048 }
  0x44   : > { %p2356_p11 = scmp.ne.s32.totalorder %s3040_s3, %s2355_s14  ;;  %p2362_p0 = scmp.lt.u32.totalorder %s2355_s14, %s3040_s3 }
  0x46   : > { %p2358_p12 = pnand %p2356_p11, %p2673_p8 }
  0x48   : > { %p2359_p13 = pneg %p2358_p12 }
  0x4a   : > { %p2364_p2 = pnand %p2362_p0, %p2359_p13 }
  0x4c   : > { %2367 = shalt.err (!%p2364_p2)
}
  0x4d   : > { %s2368_s26 = scalar_lea.vmem %s2663_s29, 2048  ;;  %p2376_p4 = scmp.lt.s32.totalorder %s2663_s29, %s2663_s29 }
  0x4e   : > { %p2369_p5 = scmp.ne.s32.totalorder %s2663_s29, %s2368_s26  ;;  %p2377_p10 = scmp.lt.s32.totalorder %s2368_s26, %s2368_s26 }
  0x50   : > { %p2371_p7 = pnand %p2369_p5, %p2673_p8  ;;  %p2378_p11 = por %p2377_p10, %p2376_p4 }
  0x52   : > { %p2372_p9 = pneg %p2371_p7 }
  0x54   : > { %p2379_p12 = pnand %p2378_p11, %p2372_p9 }
  0x56   : > { %2382 = shalt.err (!%p2379_p12)
}
  0x57   : > { %2228 = dma.hbm_to_vmem [thread:$0]  (!%p2657_p6), %s3040_s3, 2048, %s2663_s29, [#allocation6], %s3052_s30, %s3052_s30, %s2553_s12  }
  0x58   : > { %s2554_s10 = smov [#allocation10]   ;;  %s2555_s13 = smov [#allocation11]  }
  0x59   : > { %s357_s11 = sshll.u32 %s2554_s10, 4  ;;  %s373_s14 = sshll.u32 %s2555_s13, 4  ;;  %s358_s11 = int_to_ptr.vmem [resolvable:$true] %s357_s11  ;;  %s374_s14 = int_to_ptr.vmem [resolvable:$true] %s373_s14 }
  0x5a   : > { %s2383_s25 = scalar_lea.hbm %s3044_s7, 2048 }
  0x5b   : > { %p2384_p13 = scmp.ne.s32.totalorder %s3044_s7, %s2383_s25  ;;  %p2390_p5 = scmp.lt.u32.totalorder %s2383_s25, %s3044_s7 }
  0x5d   : > { %p2386_p0 = pnand %p2384_p13, %p2673_p8 }
  0x5f   : > { %p2387_p2 = pneg %p2386_p0 }
  0x61   : > { %p2392_p7 = pnand %p2390_p5, %p2387_p2 }
  0x63   : > { %2395 = shalt.err (!%p2392_p7)
}
  0x64   : > { %s2396_s29 = scalar_lea.vmem %s358_s11, 2048  ;;  %p2404_p11 = scmp.lt.s32.totalorder %s358_s11, %s358_s11 }
  0x65   : > { %p2397_p9 = scmp.ne.s32.totalorder %s358_s11, %s2396_s29  ;;  %p2405_p12 = scmp.lt.s32.totalorder %s2396_s29, %s2396_s29 }
  0x67   : > { %p2399_p4 = pnand %p2397_p9, %p2673_p8  ;;  %p2406_p1 = por %p2405_p12, %p2404_p11 }
  0x69   : > { %p2400_p10 = pneg %p2399_p4 }
  0x6b   : > { %p2407_p3 = pnand %p2406_p1, %p2400_p10 }
  0x6d   : > { %2410 = shalt.err (!%p2407_p3)
}
  0x6e   : > { %2234 = dma.hbm_to_vmem [thread:$0]  (!%p2657_p6), %s3044_s7, 2048, %s358_s11, [#allocation9], %s3052_s30, %s3052_s30, %s2553_s12  }
  0x6f   : > { %s2411_s15 = scalar_lea.hbm %s3046_s9, 2048 }
  0x70   : > { %p2412_p1 = scmp.ne.s32.totalorder %s3046_s9, %s2411_s15  ;;  %p2418_p0 = scmp.lt.u32.totalorder %s2411_s15, %s3046_s9 }
  0x72   : > { %p2414_p3 = pnand %p2412_p1, %p2673_p8 }
  0x74   : > { %p2415_p13 = pneg %p2414_p3 }
  0x76   : > { %p2420_p2 = pnand %p2418_p0, %p2415_p13 }
  0x78   : > { %2423 = shalt.err (!%p2420_p2)
}
  0x79   : > { %s2424_s22 = scalar_lea.vmem %s374_s14, 2048  ;;  %p2432_p4 = scmp.lt.s32.totalorder %s374_s14, %s374_s14 }
  0x7a   : > { %p2425_p5 = scmp.ne.s32.totalorder %s374_s14, %s2424_s22  ;;  %p2433_p10 = scmp.lt.s32.totalorder %s2424_s22, %s2424_s22 }
  0x7c   : > { %p2427_p7 = pnand %p2425_p5, %p2673_p8  ;;  %p2434_p11 = por %p2433_p10, %p2432_p4 }
  0x7e   : > { %p2428_p9 = pneg %p2427_p7 }
  0x80   : > { %p2435_p12 = pnand %p2434_p11, %p2428_p9 }
  0x82   : > { %2438 = shalt.err (!%p2435_p12)
}
  0x83   : > { %2237 = dma.hbm_to_vmem [thread:$0]  (!%p2657_p6), %s3046_s9, 2048, %s374_s14, [#allocation12], %s3052_s30, %s3052_s30, %s2553_s12  }
  0x84   : > { %s1551_s27 = sadd.s32 4294967294, %s2547_s20   ;;  %s2793_s16 = sadd.s32 1, %s2547_s20  }
  0x85   : > { %s37_s1 = sadd.s32 1, %s2543_s19  ;;  %s34_s8 = ssub.s32 %s2547_s20, %s2793_s16 }
  0x86   : > { %p44_p8 = scmp.ne.s32.totalorder %s2543_s19, %s2539_s18  ;;  %p35_p1 = scmp.eq.s32.totalorder %s34_s8, 0 }
  0x87   : > { %p45_p3 = scmp.eq.s32.totalorder %s2547_s20, 0  ;;  %p50_p13 = scmp.ne.s32.totalorder %s2539_s18, %s2535_s17 }
  0x88   : > { %p284_p0 = scmp.eq.s32.totalorder %s2641_s23, 1  ;;  %p3062_p5 = scmp.eq.s32.totalorder %s2641_s23, 0 }
  0x89   : > { %s2805_s10 = scalar_select %p35_p1, %s2543_s19, %s37_s1  }
  0x8a   : > { %p46_p2 = por %p45_p3, %p44_p8  ;;  %p2809_p7 = por %p3062_p5, %p50_p13 }
  0x8b   : > { %p2813_p6 = por %p284_p0, %p44_p8  ;;  %p290_p9 = scmp.eq.s32.totalorder %s1551_s27, 1 }
  0x8c   : > { %p2251_p4 = scmp.lt.s32.totalorder %s2547_s20, 2  ;;  %s390_s15 = sand.u32 1, %s2543_s19  }
  0x8d   : > { %s3064_s14 = scalar_select %p2813_p6, 1, 0 }
  0x8e   : > { %p2819_p10 = por %p290_p9, %p50_p13  ;;  %s1559_s25 = sshll.u32 %s390_s15, 7 }
  0x8f   : > { %s1580_s28 = sshll.u32 %s2547_s20, 11  ;;  %s394_s29 = scalar_lea.vmem [#allocation2], %s1559_s25 }
  0x90   : > { %s3065_s21 = scalar_select %p2819_p10, 1, 0 }
  0x91   : > { %s2827_s11 = scalar_lea.hbm %s3037_s0, %s1580_s28  ;;  %s401_s1 = sshll.u32 %s394_s29, 4  ;;  %s2833_s1 = int_to_ptr.vmem [resolvable:$true] %s401_s1 }
  0x92   : > { %p2829_p11 = pnand %p2251_p4, %p46_p2  ;;  %s2835_s8 = scalar_lea.sflag [#allocation3], %s390_s15 }
  0x93   : > { %s2439_s30 = scalar_lea.hbm %s2827_s11, 2048  ;;  %s2444_s26 = scalar_lea.hbm %s3037_s0, 4096 }
  0x94   : > { %p2440_p12 = scmp.ne.s32.totalorder %s2827_s11, %s2439_s30  ;;  %p2441_p8 = pneg %p2829_p11 }
  0x95   : > { %p2445_p13 = scmp.lt.u32.totalorder %s2827_s11, %s3037_s0  ;;  %p2446_p0 = scmp.lt.u32.totalorder %s2444_s26, %s2439_s30 }
  0x96   : > { %p2442_p1 = pnand %p2441_p8, %p2440_p12  ;;  %p2448_p5 = scmp.lt.u32.totalorder %s2439_s30, %s2827_s11 }
  0x97   : > { %p2447_p2 = por %p2446_p0, %p2445_p13 }
  0x98   : > { %p2443_p3 = pneg %p2442_p1 }
  0x99   : > { %p2449_p9 = por %p2448_p5, %p2447_p2 }
  0x9b   : > { %p2450_p4 = pnand %p2449_p9, %p2443_p3 }
  0x9d   : > { %2453 = shalt.err (!%p2450_p4)
}
  0x9e   : > { %s2454_s15 = scalar_lea.vmem %s2833_s1, 2048  ;;  %s2556_s25 = smov [#allocation2]  }
  0x9f   : > { %p2455_p12 = scmp.ne.s32.totalorder %s2833_s1, %s2454_s15  ;;  %s2459_s28 = sshll.u32 %s2556_s25, 4  ;;  %s2460_s28 = int_to_ptr.vmem [resolvable:$false] %s2459_s28 }
  0xa0   : > { %s2461_s22 = scalar_lea.vmem %s2460_s28, 4096  ;;  %p2462_p6 = scmp.lt.s32.totalorder %s2833_s1, %s2460_s28 }
  0xa1   : > { %p2457_p1 = pnand %p2455_p12, %p2441_p8  ;;  %p2463_p13 = scmp.lt.s32.totalorder %s2461_s22, %s2454_s15 }
  0xa3   : > { %p2458_p10 = pneg %p2457_p1  ;;  %p2464_p0 = por %p2463_p13, %p2462_p6 }
  0xa5   : > { %p2465_p2 = pnand %p2464_p0, %p2458_p10 }
  0xa7   : > { %2468 = shalt.err (!%p2465_p2)
}
  0xa8   : > { %s3067_s30 = smov 128   ;;  %p3068_p8 = scmp.ne.s32.totalorder %s3058_s24, 0 }
  0xa9   : > { %2241 = dma.hbm_to_vmem [thread:$0]  (!%p2829_p11), %s2827_s11, 2048, %s2833_s1, %s2835_s8, %s3067_s30, %s3067_s30, %s2553_s12  }
  0xaa   : > { %413 = sbr.rel (%p3068_p8) target bundleno = 1353 (0x549), region = 64  ;;  %s2869_s26 = sand.u32 (!%p3068_p8), 1, %s2539_s18  }
  0xab   : > { %s1563_s29 = sshll.u32 (!%p3068_p8), %s2869_s26, 7  ;;  %s416_s15 = scalar_lea.sflag (!%p3068_p8), [#allocation3], %s2869_s26 }
  0xac   : > { %s2875_s27 = scalar_lea.vmem (!%p3068_p8), [#allocation2], %s1563_s29 }
  0xb1   : > { %2514 = dma.done.wait (%p2809_p7), %s416_s15, 2048  }
  0xb2   : > { %2516 = vsyncadd (%p2809_p7), %s416_s15, 4294965248  ;;  %p3069_p6 = scmp.eq.s32.totalorder %s2641_s23, 0 }
  0xb4   : > { %2518 = dma.done.wait (%p3069_p6), [#allocation6], 4096   ;;  %p3070_p10 = pmov %p3069_p6 }
  0xb5   : > { %p3071_p11 = pmov %p3069_p6 }
  0xb6   : > { %2520 = vsyncadd (%p3070_p10), [#allocation6], 4294963200 }
  0xb7   : > { %2522 = dma.done.wait (%p3071_p11), [#allocation9], 4096   ;;  %p3072_p3 = pmov %p3069_p6 }
  0xb9   : > { %2524 = vsyncadd (%p3072_p3), [#allocation9], 4294963200  ;;  %p3073_p5 = pmov %p3072_p3 }
  0xba   : > { %p3074_p9 = pmov %p3072_p3 }
  0xbb   : > { %2526 = dma.done.wait (%p3073_p5), [#allocation12], 2048  }
  0xbc   : > { %2528 = vsyncadd (%p3074_p9), [#allocation12], 4294965248  ;;  %v496_v0 = vld [vmem:[#allocation5] sm:$0xff]  ;;  %v497_v1 = vld [vmem:[#allocation5 + $0x8] sm:$0xff]  ;;  %s3075_s22 = sld [smem:[#allocation20_spill]]  ;;  %s2968_s24 = scalar_lea.vmem [#allocation13], %s1563_s29 }
  0xbd   : > { %v498_v2 = vld [vmem:[#allocation5 + $0x10] sm:$0xff]  ;;  %v2022_v3 = vpack.c.bf16 %v497_v1, %v496_v0  ;;  %v499_v4 = vld [vmem:[#allocation5 + $0x18] sm:$0xff]  ;;  %v500_v6 = vld [vmem:[#allocation5 + $0x20] sm:$0xff]  ;;  %s1581_s29 = sshll.u32 %s2641_s23, 11  ;;  %s1430_s12 = sshll.u32 %s2968_s24, 4  ;;  %s2991_s12 = int_to_ptr.vmem [resolvable:$true] %s1430_s12 }
  0xbe   : > { %v2026_v5 = vpack.c.bf16 %v499_v4, %v498_v2  ;;  %v501_v7 = vld [vmem:[#allocation5 + $0x28] sm:$0xff]  ;;  %v480_v9 = vld [vmem:[%s2875_s27] sm:$0xff]  ;;  %v502_v10 = vld [vmem:[#allocation5 + $0x30] sm:$0xff]  ;;  %s3077_s1 = sld [smem:[#allocation22_spill]]  ;;  %s1417_s23 = scalar_lea.sflag [#allocation4], %s2869_s26 }
  0xbf   : > { %2023 = vmatprep.subr.bf16.mxu0 %v2022_v3  ;;  %v2030_v8 = vpack.c.bf16 %v501_v7, %v500_v6  ;;  %v503_v11 = vld [vmem:[#allocation5 + $0x38] sm:$0xff]  ;;  %1774 = vmatprep.mubr.f32.mxu0 %v480_v9  ;;  %v504_v13 = vld [vmem:[#allocation5 + $0x40] sm:$0xff]  ;;  %v505_v14 = vld [vmem:[#allocation5 + $0x48] sm:$0xff]  ;;  %s2469_s25 = scalar_lea.vmem %s2991_s12, 2048  ;;  %p3078_p4 = scmp.ne.s32.totalorder %s3064_s14, 0 }
  0xc0   : > { %2025 = vmatpush3.bf16.msra.mxu0 %v2022_v3  ;;  %v2034_v12 = vpack.c.bf16 %v503_v11, %v502_v10  ;;  %v680_v15 = vld [vmem:[#allocation7] sm:$0xff]  ;;  %v681_v16 = vld [vmem:[#allocation7 + $0x8] sm:$0xff]  ;;  %v682_v17 = vld [vmem:[#allocation7 + $0x10] sm:$0xff]  ;;  %v2038_v21 = vpack.c.bf16 %v505_v14, %v504_v13  ;;  %p2470_p7 = scmp.ne.s32.totalorder %s2991_s12, %s2469_s25  ;;  %s2557_s28 = smov [#allocation13]  }
  0xc1   : > { %2027 = vmatprep.subr.bf16.mxu0 %v2026_v5  ;;  %v683_v18 = vld [vmem:[#allocation7 + $0x18] sm:$0xff]  ;;  %v2054_v19 = vpack.c.bf16 %v681_v16, %v680_v15  ;;  %v684_v22 = vld [vmem:[#allocation7 + $0x20] sm:$0xff]  ;;  %v685_v23 = vld [vmem:[#allocation7 + $0x28] sm:$0xff] }
  0xc2   : > { %v2058_v20 = vpack.c.bf16 %v683_v18, %v682_v17  ;;  %v506_v24 = vld [vmem:[#allocation5 + $0x50] sm:$0xff]  ;;  %v507_v25 = vld [vmem:[#allocation5 + $0x58] sm:$0xff]  ;;  %v2062_v26 = vpack.c.bf16 %v685_v23, %v684_v22  ;;  %v508_v30 = vld [vmem:[#allocation5 + $0x60] sm:$0xff]  ;;  %p2471_p12 = pnand %p2470_p7, %p3078_p4 }
  0xc3   : > { %2055 = vmatprep.subr.bf16.mxu1 %v2054_v19  ;;  %v2042_v27 = vpack.c.bf16 %v507_v25, %v506_v24  ;;  %v686_v28 = vld [vmem:[#allocation7 + $0x30] sm:$0xff]  ;;  %v687_v29 = vld [vmem:[#allocation7 + $0x38] sm:$0xff]  ;;  %v509_v31 = vld [vmem:[#allocation5 + $0x68] sm:$0xff] }
  0xc4   : > { %2029 = vmatpush3.bf16.msra.mxu0 %v2026_v5  ;;  %2057 = vmatpush3.bf16.msra.mxu1 %v2054_v19  ;;  %v2066_v32 = vpack.c.bf16 %v687_v29, %v686_v28  ;;  %v2046_v33 = vpack.c.bf16 %v509_v31, %v508_v30  ;;  %v688_v34 = vld [vmem:[#allocation7 + $0x40] sm:$0xff]  ;;  %v689_v35 = vld [vmem:[#allocation7 + $0x48] sm:$0xff]  ;;  %v510_v36 = vld [vmem:[#allocation5 + $0x70] sm:$0xff]  ;;  %s2989_s8 = scalar_lea.hbm %s3077_s1, %s1581_s29  ;;  %p2472_p1 = pneg %p2471_p12 }
  0xc5   : > { %2031 = vmatprep.subr.bf16.mxu0 %v2030_v8  ;;  %2059 = vmatprep.subr.bf16.mxu1 %v2058_v20  ;;  %v511_v37 = vld [vmem:[#allocation5 + $0x78] sm:$0xff]  ;;  %v2070_v38 = vpack.c.bf16 %v689_v35, %v688_v34  ;;  %v690_v40 = vld [vmem:[#allocation7 + $0x50] sm:$0xff]  ;;  %v692_v43 = vld [vmem:[#allocation7 + $0x60] sm:$0xff] }
  0xc6   : > { %v2050_v39 = vpack.c.bf16 %v511_v37, %v510_v36  ;;  %v691_v41 = vld [vmem:[#allocation7 + $0x58] sm:$0xff]  ;;  %v693_v44 = vld [vmem:[#allocation7 + $0x68] sm:$0xff]  ;;  %v482_v47 = vld [vmem:[%s2875_s27 + $0x10] sm:$0xff] }
  0xc7   : > { %v2074_v42 = vpack.c.bf16 %v691_v41, %v690_v40  ;;  %v481_v45 = vld [vmem:[%s2875_s27 + $0x8] sm:$0xff]  ;;  %v2078_v46 = vpack.c.bf16 %v693_v44, %v692_v43  ;;  %v483_v48 = vld [vmem:[%s2875_s27 + $0x18] sm:$0xff]  ;;  %v484_v49 = vld [vmem:[%s2875_s27 + $0x20] sm:$0xff] }
  0xc8   : > { %2033 = vmatpush3.bf16.msra.mxu0 %v2030_v8  ;;  %2061 = vmatpush3.bf16.msra.mxu1 %v2058_v20  ;;  %v485_v50 = vld [vmem:[%s2875_s27 + $0x28] sm:$0xff]  ;;  %v486_v51 = vld [vmem:[%s2875_s27 + $0x30] sm:$0xff]  ;;  %v487_v52 = vld [vmem:[%s2875_s27 + $0x38] sm:$0xff] }
  0xc9   : > { %2035 = vmatprep.subr.bf16.mxu0 %v2034_v12  ;;  %2063 = vmatprep.subr.bf16.mxu1 %v2062_v26  ;;  %v488_v53 = vld [vmem:[%s2875_s27 + $0x40] sm:$0xff]  ;;  %v489_v54 = vld [vmem:[%s2875_s27 + $0x48] sm:$0xff]  ;;  %v490_v55 = vld [vmem:[%s2875_s27 + $0x50] sm:$0xff] }
  0xca   : > { %v491_v56 = vld [vmem:[%s2875_s27 + $0x58] sm:$0xff]  ;;  %v492_v57 = vld [vmem:[%s2875_s27 + $0x60] sm:$0xff]  ;;  %v493_v58 = vld [vmem:[%s2875_s27 + $0x68] sm:$0xff] }
  0xcb   : > { %v494_v59 = vld [vmem:[%s2875_s27 + $0x70] sm:$0xff]  ;;  %v495_v60 = vld [vmem:[%s2875_s27 + $0x78] sm:$0xff]  ;;  %v864_v0 = vld [vmem:[#allocation8] sm:$0xff]  ;;  %s3076_s27 = sld [smem:[#allocation21_spill]] }
  0xcc   : > { %2037 = vmatpush3.bf16.msra.mxu0 %v2034_v12  ;;  %2065 = vmatpush3.bf16.msra.mxu1 %v2062_v26  ;;  %v694_v61 = vld [vmem:[#allocation7 + $0x70] sm:$0xff]  ;;  %v695_v62 = vld [vmem:[#allocation7 + $0x78] sm:$0xff]  ;;  %v865_v1 = vld [vmem:[#allocation8 + $0x8] sm:$0xff] }
  0xcd   : > { %2039 = vmatprep.subr.bf16.mxu0 %v2038_v21  ;;  %2067 = vmatprep.subr.bf16.mxu1 %v2066_v32  ;;  %v2082_v63 = vpack.c.bf16 %v695_v62, %v694_v61  ;;  %v866_v2 = vld [vmem:[#allocation8 + $0x10] sm:$0xff]  ;;  %v2086_v3 = vpack.c.bf16 %v865_v1, %v864_v0  ;;  %v867_v4 = vld [vmem:[#allocation8 + $0x18] sm:$0xff]  ;;  %v868_v6 = vld [vmem:[#allocation8 + $0x20] sm:$0xff] }
  0xce   : > { %v2090_v5 = vpack.c.bf16 %v867_v4, %v866_v2  ;;  %v869_v7 = vld [vmem:[#allocation8 + $0x28] sm:$0xff]  ;;  %v870_v9 = vld [vmem:[#allocation8 + $0x30] sm:$0xff]  ;;  %v871_v10 = vld [vmem:[#allocation8 + $0x38] sm:$0xff] }
  0xcf   : > { %v2094_v8 = vpack.c.bf16 %v869_v7, %v868_v6  ;;  %v2098_v11 = vpack.c.bf16 %v871_v10, %v870_v9  ;;  %v872_v12 = vld [vmem:[#allocation8 + $0x40] sm:$0xff]  ;;  %v873_v13 = vld [vmem:[#allocation8 + $0x48] sm:$0xff]  ;;  %v874_v15 = vld [vmem:[#allocation8 + $0x50] sm:$0xff] }
  0xd0   : > { %2041 = vmatpush3.bf16.msra.mxu0 %v2038_v21  ;;  %2069 = vmatpush3.bf16.msra.mxu1 %v2066_v32  ;;  %v2102_v14 = vpack.c.bf16 %v873_v13, %v872_v12  ;;  %v875_v16 = vld [vmem:[#allocation8 + $0x58] sm:$0xff]  ;;  %v876_v18 = vld [vmem:[#allocation8 + $0x60] sm:$0xff]  ;;  %v877_v19 = vld [vmem:[#allocation8 + $0x68] sm:$0xff] }
  0xd1   : > { %2043 = vmatprep.subr.bf16.mxu0 %v2042_v27  ;;  %2071 = vmatprep.subr.bf16.mxu1 %v2070_v38  ;;  %v2106_v17 = vpack.c.bf16 %v875_v16, %v874_v15  ;;  %v2110_v20 = vpack.c.bf16 %v877_v19, %v876_v18  ;;  %v1570_v21 = vld [vmem:[%s3039_s2] ss:$0 sm:$0xff]  ;;  %v878_v6 = vld [vmem:[#allocation8 + $0x70] sm:$0xff]  ;;  %v879_v7 = vld [vmem:[#allocation8 + $0x78] sm:$0xff] }
  0xd2   : > { %v1048_v9 = vld [vmem:[#allocation10] sm:$0xff]  ;;  %v1049_v10 = vld [vmem:[#allocation10 + $0x8] sm:$0xff]  ;;  %v1051_v13 = vld [vmem:[#allocation10 + $0x18] sm:$0xff] }
  0xd3   : > { %v2118_v12 = vpack.c.bf16 %v1049_v10, %v1048_v9  ;;  %v1052_v15 = vld [vmem:[#allocation10 + $0x20] sm:$0xff]  ;;  %v1053_v16 = vld [vmem:[#allocation10 + $0x28] sm:$0xff]  ;;  %v1054_v18 = vld [vmem:[#allocation10 + $0x30] sm:$0xff] }
  0xd4   : > { %2045 = vmatpush3.bf16.msra.mxu0 %v2042_v27  ;;  %2073 = vmatpush3.bf16.msra.mxu1 %v2070_v38  ;;  %v1055_v19 = vld [vmem:[#allocation10 + $0x38] sm:$0xff] }
  0xd5   : > { %2047 = vmatprep.subr.bf16.mxu0 %v2046_v33  ;;  %2075 = vmatprep.subr.bf16.mxu1 %v2074_v42 }
  0xd8   : > { %2049 = vmatpush3.bf16.msra.mxu0 %v2046_v33  ;;  %2077 = vmatpush3.bf16.msra.mxu1 %v2074_v42 }
  0xd9   : > { %2051 = vmatprep.subr.bf16.mxu0 %v2050_v39  ;;  %2079 = vmatprep.subr.bf16.mxu1 %v2078_v46 }
  0xdc   : > { %2053 = vmatpush3.bf16.msra.mxu0 %v2050_v39  ;;  %2081 = vmatpush3.bf16.msra.mxu1 %v2078_v46 }
  0xdd   : > { %2083 = vmatprep.subr.bf16.mxu1 %v2082_v63  ;;  %2087 = vmatprep.subr.bf16.mxu0 %v2086_v3 }
  0xdf   : > { %1775 = vmatmul.mubr.f32.vlgmr.msra.gmra.mrb[0].mxu0 %v481_v45 }
  0xe0   : > { %1777 = vmatprep.mubr.f32.mxu0 %v482_v47  ;;  %2085 = vmatpush3.bf16.msra.mxu1 %v2082_v63 }
  0xe1   : > { %2089 = vmatpush3.bf16.msra.mxu0 %v2086_v3  ;;  %2119 = vmatprep.subr.bf16.mxu1 %v2118_v12 }
  0xe2   : > { %2091 = vmatprep.subr.bf16.mxu0 %v2090_v5 }
  0xe3   : > { %1778 = vmatmul.mubr.f32.gmra.mrb[2].mxu0 %v483_v48 }
  0xe4   : > { %1780 = vmatprep.mubr.f32.mxu0 %v484_v49 }
  0xe5   : > { %2093 = vmatpush3.bf16.msra.mxu0 %v2090_v5 }
  0xe6   : > { %2095 = vmatprep.subr.bf16.mxu0 %v2094_v8 }
  0xe7   : > { %1781 = vmatmul.mubr.f32.gmra.mrb[4].mxu0 %v485_v50 }
  0xe8   : > { %1783 = vmatprep.mubr.f32.mxu0 %v486_v51 }
  0xe9   : > { %2097 = vmatpush3.bf16.msra.mxu0 %v2094_v8  ;;  %v2114_v8 = vpack.c.bf16 %v879_v7, %v878_v6 }
  0xea   : > { %2099 = vmatprep.subr.bf16.mxu0 %v2098_v11 }
  0xeb   : > { %1784 = vmatmul.mubr.f32.gmra.mrb[6].mxu0 %v487_v52 }
  0xec   : > { %1786 = vmatprep.mubr.f32.mxu0 %v488_v53 }
  0xed   : > { %2101 = vmatpush3.bf16.msra.mxu0 %v2098_v11  ;;  %v1050_v11 = vld [vmem:[#allocation10 + $0x10] sm:$0xff] }
  0xee   : > { %2103 = vmatprep.subr.bf16.mxu0 %v2102_v14 }
  0xef   : > { %1787 = vmatmul.mubr.f32.gmra.mrb[8].mxu0 %v489_v54 }
  0xf0   : > { %1789 = vmatprep.mubr.f32.mxu0 %v490_v55 }
  0xf1   : > { %2105 = vmatpush3.bf16.msra.mxu0 %v2102_v14  ;;  %v2122_v14 = vpack.c.bf16 %v1051_v13, %v1050_v11 }
  0xf2   : > { %2107 = vmatprep.subr.bf16.mxu0 %v2106_v17 }
  0xf3   : > { %1790 = vmatmul.mubr.f32.gmra.mrb[10].mxu0 %v491_v56 }
  0xf4   : > { %1792 = vmatprep.mubr.f32.mxu0 %v492_v57 }
  0xf5   : > { %2109 = vmatpush3.bf16.msra.mxu0 %v2106_v17  ;;  %v2126_v17 = vpack.c.bf16 %v1053_v16, %v1052_v15  ;;  %v1062_v15 = vld [vmem:[#allocation10 + $0x70] sm:$0xff]  ;;  %v1063_v16 = vld [vmem:[#allocation10 + $0x78] sm:$0xff] }
  0xf6   : > { %2111 = vmatprep.subr.bf16.mxu0 %v2110_v20 }
  0xf7   : > { %1793 = vmatmul.mubr.f32.gmra.mrb[12].mxu0 %v493_v58 }
  0xf8   : > { %1795 = vmatprep.mubr.f32.mxu0 %v494_v59 }
  0xf9   : > { %2113 = vmatpush3.bf16.msra.mxu0 %v2110_v20  ;;  %v2130_v20 = vpack.c.bf16 %v1055_v19, %v1054_v18  ;;  %v1232_v18 = vld [vmem:[#allocation11] sm:$0xff]  ;;  %v1233_v19 = vld [vmem:[#allocation11 + $0x8] sm:$0xff] }
  0xfa   : > { %2115 = vmatprep.subr.bf16.mxu0 %v2114_v8 }
  0xfb   : > { %1796 = vmatmul.mubr.f32.gmra.mrb[14].mxu0 %v495_v60 }
  0xfd   : > { %2117 = vmatpush3.bf16.msra.mxu0 %v2114_v8 }
 0x1b2   : > { %v1776_v22 = vpop.f32.mrb[0].mxu0 }
 0x1b3   : > { %v591_v23 = vadd.f32 %v1776_v22, %v1570_v21  ;;  %v585_v24 = vpop.f32.mrb[1].mxu0  ;;  %v1057_v22 = vld [vmem:[#allocation10 + $0x48] sm:$0xff] }
 0x1b4   : > { %v586_v25 = vadd.f32 %v1570_v21, %v585_v24  ;;  %v1058_v24 = vld [vmem:[#allocation10 + $0x50] sm:$0xff] }
 0x1b5   : > { %v665_v28 = vmax.f32 %v591_v23, 0.0 }
 0x1b6   : > { %v1779_v26 = vpop.f32.mrb[2].mxu0  ;;  %v664_v27 = vmax.f32 %v586_v25, 0.0  ;;  %v1059_v25 = vld [vmem:[#allocation10 + $0x58] sm:$0xff] }
 0x1b7   : > { %v601_v29 = vadd.f32 %v1779_v26, %v1570_v21  ;;  %v595_v30 = vpop.f32.mrb[3].mxu0  ;;  %v2138_v26 = vpack.c.bf16 %v1059_v25, %v1058_v24  ;;  %v1236_v24 = vld [vmem:[#allocation11 + $0x20] sm:$0xff]  ;;  %v1237_v25 = vld [vmem:[#allocation11 + $0x28] sm:$0xff] }
 0x1b8   : > { %v596_v31 = vadd.f32 %v1570_v21, %v595_v30  ;;  %1830 = vmatprep.mubr.f32.mxu1 %v664_v27  ;;  %v1060_v27 = vld [vmem:[#allocation10 + $0x60] sm:$0xff] }
 0x1b9   : > { %1831 = vmatmul.mubr.f32.vlgmr.msra.gmra.mrb[0].mxu1 %v665_v28  ;;  %v667_v34 = vmax.f32 %v601_v29, 0.0  ;;  %v1061_v28 = vld [vmem:[#allocation10 + $0x68] sm:$0xff]  ;;  %v1571_v30 = vld [vmem:[%s3041_s4] ss:$0 sm:$0xff] }
 0x1ba   : > { %v666_v32 = vmax.f32 %v596_v31, 0.0  ;;  %v1782_v33 = vpop.f32.mrb[4].mxu0  ;;  %2121 = vmatpush3.bf16.msra.mxu1 %v2118_v12  ;;  %v2142_v29 = vpack.c.bf16 %v1061_v28, %v1060_v27  ;;  %v1238_v27 = vld [vmem:[#allocation11 + $0x30] sm:$0xff]  ;;  %v1239_v28 = vld [vmem:[#allocation11 + $0x38] sm:$0xff] }
 0x1bb   : > { %v611_v35 = vadd.f32 %v1782_v33, %v1570_v21  ;;  %v605_v36 = vpop.f32.mrb[5].mxu0  ;;  %2123 = vmatprep.subr.bf16.mxu1 %v2122_v14 }
 0x1bc   : > { %v606_v37 = vadd.f32 %v1570_v21, %v605_v36  ;;  %1833 = vmatprep.mubr.f32.mxu1 %v666_v32 }
 0x1bd   : > { %1834 = vmatmul.mubr.f32.gmra.mrb[2].mxu1 %v667_v34  ;;  %v669_v40 = vmax.f32 %v611_v35, 0.0 }
 0x1be   : > { %v668_v38 = vmax.f32 %v606_v37, 0.0  ;;  %v1785_v39 = vpop.f32.mrb[6].mxu0  ;;  %2125 = vmatpush3.bf16.msra.mxu1 %v2122_v14 }
 0x1bf   : > { %v621_v41 = vadd.f32 %v1785_v39, %v1570_v21  ;;  %v615_v42 = vpop.f32.mrb[7].mxu0  ;;  %2127 = vmatprep.subr.bf16.mxu1 %v2126_v17 }
 0x1c0   : > { %v616_v43 = vadd.f32 %v1570_v21, %v615_v42  ;;  %1836 = vmatprep.mubr.f32.mxu1 %v668_v38 }
 0x1c1   : > { %1837 = vmatmul.mubr.f32.gmra.mrb[4].mxu1 %v669_v40  ;;  %v671_v46 = vmax.f32 %v621_v41, 0.0 }
 0x1c2   : > { %v670_v44 = vmax.f32 %v616_v43, 0.0  ;;  %v1788_v45 = vpop.f32.mrb[8].mxu0  ;;  %2129 = vmatpush3.bf16.msra.mxu1 %v2126_v17  ;;  %v2146_v17 = vpack.c.bf16 %v1063_v16, %v1062_v15 }
 0x1c3   : > { %v631_v47 = vadd.f32 %v1788_v45, %v1570_v21  ;;  %v625_v48 = vpop.f32.mrb[9].mxu0  ;;  %2131 = vmatprep.subr.bf16.mxu1 %v2130_v20 }
 0x1c4   : > { %v626_v49 = vadd.f32 %v1570_v21, %v625_v48  ;;  %1839 = vmatprep.mubr.f32.mxu1 %v670_v44 }
 0x1c5   : > { %1840 = vmatmul.mubr.f32.gmra.mrb[6].mxu1 %v671_v46  ;;  %v673_v52 = vmax.f32 %v631_v47, 0.0 }
 0x1c6   : > { %v672_v50 = vmax.f32 %v626_v49, 0.0  ;;  %v1791_v51 = vpop.f32.mrb[10].mxu0  ;;  %2133 = vmatpush3.bf16.msra.mxu1 %v2130_v20  ;;  %v1234_v20 = vld [vmem:[#allocation11 + $0x10] sm:$0xff] }
 0x1c7   : > { %v641_v53 = vadd.f32 %v1791_v51, %v1570_v21  ;;  %v635_v54 = vpop.f32.mrb[11].mxu0 }
 0x1c8   : > { %v636_v55 = vadd.f32 %v1570_v21, %v635_v54  ;;  %1842 = vmatprep.mubr.f32.mxu1 %v672_v50 }
 0x1c9   : > { %1843 = vmatmul.mubr.f32.gmra.mrb[8].mxu1 %v673_v52  ;;  %v675_v58 = vmax.f32 %v641_v53, 0.0 }
 0x1ca   : > { %v674_v56 = vmax.f32 %v636_v55, 0.0  ;;  %v1794_v57 = vpop.f32.mrb[12].mxu0 }
 0x1cb   : > { %v651_v59 = vadd.f32 %v1794_v57, %v1570_v21  ;;  %v645_v60 = vpop.f32.mrb[13].mxu0 }
 0x1cc   : > { %v646_v61 = vadd.f32 %v1570_v21, %v645_v60  ;;  %1845 = vmatprep.mubr.f32.mxu1 %v674_v56 }
 0x1cd   : > { %1846 = vmatmul.mubr.f32.gmra.mrb[10].mxu1 %v675_v58  ;;  %v677_v0 = vmax.f32 %v651_v59, 0.0 }
 0x1ce   : > { %v676_v62 = vmax.f32 %v646_v61, 0.0  ;;  %v1797_v63 = vpop.f32.mrb[14].mxu0 }
 0x1cf   : > { %v661_v1 = vadd.f32 %v1797_v63, %v1570_v21  ;;  %v655_v2 = vpop.f32.mrb[15].mxu0 }
 0x1d0   : > { %v656_v3 = vadd.f32 %v1570_v21, %v655_v2  ;;  %1848 = vmatprep.mubr.f32.mxu1 %v676_v62  ;;  %v1056_v21 = vld [vmem:[#allocation10 + $0x40] sm:$0xff] }
 0x1d1   : > { %1849 = vmatmul.mubr.f32.gmra.mrb[12].mxu1 %v677_v0  ;;  %v679_v5 = vmax.f32 %v661_v1, 0.0  ;;  %v2134_v23 = vpack.c.bf16 %v1057_v22, %v1056_v21  ;;  %v2150_v21 = vpack.c.bf16 %v1233_v19, %v1232_v18  ;;  %v1235_v22 = vld [vmem:[#allocation11 + $0x18] sm:$0xff] }
 0x1d2   : > { %v678_v4 = vmax.f32 %v656_v3, 0.0 }
 0x1d3   : > { %2135 = vmatprep.subr.bf16.mxu1 %v2134_v23  ;;  %2151 = vmatprep.subr.bf16.mxu0 %v2150_v21 }
 0x1d4   : > { %1851 = vmatprep.mubr.f32.mxu1 %v678_v4  ;;  %2137 = vmatpush3.bf16.msra.mxu1 %v2134_v23  ;;  %v2154_v23 = vpack.c.bf16 %v1235_v22, %v1234_v20 }
 0x1d5   : > { %1852 = vmatmul.mubr.f32.gmra.mrb[14].mxu1 %v679_v5  ;;  %2139 = vmatprep.subr.bf16.mxu1 %v2138_v26 }
 0x1d8   : > { %2141 = vmatpush3.bf16.msra.mxu1 %v2138_v26  ;;  %v2158_v26 = vpack.c.bf16 %v1237_v25, %v1236_v24  ;;  %v1246_v24 = vld [vmem:[#allocation11 + $0x70] sm:$0xff]  ;;  %v1247_v25 = vld [vmem:[#allocation11 + $0x78] sm:$0xff] }
 0x1d9   : > { %2143 = vmatprep.subr.bf16.mxu1 %v2142_v29 }
 0x1dc   : > { %2145 = vmatpush3.bf16.msra.mxu1 %v2142_v29  ;;  %v2915_v29 = vpack.c.bf16 %v1239_v28, %v1238_v27  ;;  %v1573_v27 = vld [vmem:[%s3075_s22] ss:$0 sm:$0xff]  ;;  %s2473_s22 = sshll.u32 %s2557_s28, 4  ;;  %s2474_s22 = int_to_ptr.vmem [resolvable:$false] %s2473_s22 }
 0x1dd   : > { %2147 = vmatprep.subr.bf16.mxu1 %v2146_v17  ;;  %s2475_s30 = scalar_lea.vmem %s2474_s22, 4096  ;;  %p2476_p13 = scmp.lt.s32.totalorder %s2991_s12, %s2474_s22 }
 0x1de   : > { %p2477_p0 = scmp.lt.s32.totalorder %s2475_s30, %s2469_s25 }
 0x1e0   : > { %2149 = vmatpush3.bf16.msra.mxu1 %v2146_v17  ;;  %p2478_p2 = por %p2477_p0, %p2476_p13 }
 0x1e1   : > { %2182 = vmatprep.subr.bf16.mxu1 %v2150_v21 }
 0x1e2   : > { %p2479_p8 = pnand %p2478_p2, %p2472_p1 }
 0x28c   : > { %v1832_v31 = vpop.f32.mrb[0].mxu1 }
 0x28d   : > { %v775_v32 = vadd.f32 %v1832_v31, %v1571_v30  ;;  %v769_v33 = vpop.f32.mrb[1].mxu1  ;;  %v1241_v31 = vld [vmem:[#allocation11 + $0x48] sm:$0xff] }
 0x28e   : > { %v770_v34 = vadd.f32 %v1571_v30, %v769_v33  ;;  %v1242_v33 = vld [vmem:[#allocation11 + $0x50] sm:$0xff] }
 0x28f   : > { %v849_v37 = vmax.f32 %v775_v32, 0.0 }
 0x290   : > { %v848_v35 = vmax.f32 %v770_v34, 0.0  ;;  %v1835_v36 = vpop.f32.mrb[2].mxu1  ;;  %v1243_v34 = vld [vmem:[#allocation11 + $0x58] sm:$0xff] }
 0x291   : > { %v785_v38 = vadd.f32 %v1835_v36, %v1571_v30  ;;  %v779_v39 = vpop.f32.mrb[3].mxu1  ;;  %v1244_v36 = vld [vmem:[#allocation11 + $0x60] sm:$0xff] }
 0x292   : > { %v780_v40 = vadd.f32 %v1571_v30, %v779_v39  ;;  %1886 = vmatprep.mubr.f32.mxu0 %v848_v35  ;;  %v2922_v35 = vpack.c.bf16 %v1243_v34, %v1242_v33  ;;  %v2934_v39 = vld [vmem:[%s3043_s6] ss:$0 sm:$0xff] }
 0x293   : > { %1887 = vmatmul.mubr.f32.vlgmr.msra.gmra.mrb[16].mxu0 %v849_v37  ;;  %v851_v43 = vmax.f32 %v785_v38, 0.0  ;;  %v1245_v37 = vld [vmem:[#allocation11 + $0x68] sm:$0xff] }
 0x294   : > { %v850_v41 = vmax.f32 %v780_v40, 0.0  ;;  %v1838_v42 = vpop.f32.mrb[4].mxu1  ;;  %2153 = vmatpush3.bf16.msra.mxu0 %v2150_v21  ;;  %v2926_v38 = vpack.c.bf16 %v1245_v37, %v1244_v36 }
 0x295   : > { %v795_v44 = vadd.f32 %v1838_v42, %v1571_v30  ;;  %v789_v45 = vpop.f32.mrb[5].mxu1  ;;  %2155 = vmatprep.subr.bf16.mxu0 %v2154_v23 }
 0x296   : > { %v790_v46 = vadd.f32 %v1571_v30, %v789_v45  ;;  %1889 = vmatprep.mubr.f32.mxu0 %v850_v41 }
 0x297   : > { %1890 = vmatmul.mubr.f32.gmra.mrb[18].mxu0 %v851_v43  ;;  %v853_v49 = vmax.f32 %v795_v44, 0.0 }
 0x298   : > { %v852_v47 = vmax.f32 %v790_v46, 0.0  ;;  %v1841_v48 = vpop.f32.mrb[6].mxu1  ;;  %2157 = vmatpush3.bf16.msra.mxu0 %v2154_v23 }
 0x299   : > { %v805_v50 = vadd.f32 %v1841_v48, %v1571_v30  ;;  %v799_v51 = vpop.f32.mrb[7].mxu1  ;;  %2159 = vmatprep.subr.bf16.mxu0 %v2158_v26 }
 0x29a   : > { %v800_v52 = vadd.f32 %v1571_v30, %v799_v51  ;;  %1892 = vmatprep.mubr.f32.mxu0 %v852_v47 }
 0x29b   : > { %1893 = vmatmul.mubr.f32.gmra.mrb[20].mxu0 %v853_v49  ;;  %v855_v55 = vmax.f32 %v805_v50, 0.0 }
 0x29c   : > { %v854_v53 = vmax.f32 %v800_v52, 0.0  ;;  %v1844_v54 = vpop.f32.mrb[8].mxu1  ;;  %2161 = vmatpush3.bf16.msra.mxu0 %v2158_v26 }
 0x29d   : > { %v815_v56 = vadd.f32 %v1844_v54, %v1571_v30  ;;  %v809_v57 = vpop.f32.mrb[9].mxu1  ;;  %2163 = vmatprep.subr.bf16.mxu0 %v2915_v29 }
 0x29e   : > { %v810_v58 = vadd.f32 %v1571_v30, %v809_v57  ;;  %1895 = vmatprep.mubr.f32.mxu0 %v854_v53 }
 0x29f   : > { %1896 = vmatmul.mubr.f32.gmra.mrb[22].mxu0 %v855_v55  ;;  %v857_v61 = vmax.f32 %v815_v56, 0.0 }
 0x2a0   : > { %v856_v59 = vmax.f32 %v810_v58, 0.0  ;;  %v1847_v60 = vpop.f32.mrb[10].mxu1  ;;  %2165 = vmatpush3.bf16.msra.mxu0 %v2915_v29 }
 0x2a1   : > { %v825_v62 = vadd.f32 %v1847_v60, %v1571_v30  ;;  %v819_v63 = vpop.f32.mrb[11].mxu1 }
 0x2a2   : > { %v820_v0 = vadd.f32 %v1571_v30, %v819_v63  ;;  %1898 = vmatprep.mubr.f32.mxu0 %v856_v59 }
 0x2a3   : > { %1899 = vmatmul.mubr.f32.gmra.mrb[24].mxu0 %v857_v61  ;;  %v859_v3 = vmax.f32 %v825_v62, 0.0 }
 0x2a4   : > { %v858_v1 = vmax.f32 %v820_v0, 0.0  ;;  %v1850_v2 = vpop.f32.mrb[12].mxu1 }
 0x2a5   : > { %v835_v4 = vadd.f32 %v1850_v2, %v1571_v30  ;;  %v829_v5 = vpop.f32.mrb[13].mxu1 }
 0x2a6   : > { %v830_v6 = vadd.f32 %v1571_v30, %v829_v5  ;;  %1901 = vmatprep.mubr.f32.mxu0 %v858_v1 }
 0x2a7   : > { %1902 = vmatmul.mubr.f32.gmra.mrb[26].mxu0 %v859_v3  ;;  %v861_v9 = vmax.f32 %v835_v4, 0.0 }
 0x2a8   : > { %v860_v7 = vmax.f32 %v830_v6, 0.0  ;;  %v1853_v8 = vpop.f32.mrb[14].mxu1 }
 0x2a9   : > { %v845_v10 = vadd.f32 %v1853_v8, %v1571_v30  ;;  %v839_v11 = vpop.f32.mrb[15].mxu1 }
 0x2aa   : > { %v840_v12 = vadd.f32 %v1571_v30, %v839_v11  ;;  %1904 = vmatprep.mubr.f32.mxu0 %v860_v7  ;;  %v1240_v30 = vld [vmem:[#allocation11 + $0x40] sm:$0xff] }
 0x2ab   : > { %1905 = vmatmul.mubr.f32.gmra.mrb[28].mxu0 %v861_v9  ;;  %v863_v14 = vmax.f32 %v845_v10, 0.0  ;;  %v2918_v32 = vpack.c.bf16 %v1241_v31, %v1240_v30 }
 0x2ac   : > { %v862_v13 = vmax.f32 %v840_v12, 0.0 }
 0x2ad   : > { %2167 = vmatprep.subr.bf16.mxu0 %v2918_v32 }
 0x2ae   : > { %1907 = vmatprep.mubr.f32.mxu0 %v862_v13  ;;  %2169 = vmatpush3.bf16.msra.mxu0 %v2918_v32 }
 0x2af   : > { %1908 = vmatmul.mubr.f32.gmra.mrb[30].mxu0 %v863_v14  ;;  %2171 = vmatprep.subr.bf16.mxu0 %v2922_v35 }
 0x2b2   : > { %2173 = vmatpush3.bf16.msra.mxu0 %v2922_v35 }
 0x2b3   : > { %2175 = vmatprep.subr.bf16.mxu0 %v2926_v38 }
 0x2b6   : > { %2177 = vmatpush3.bf16.msra.mxu0 %v2926_v38 }
 0x366   : > { %v1888_v40 = vpop.f32.mrb[16].mxu0 }
 0x367   : > { %v959_v41 = vadd.f32 %v1888_v40, %v2934_v39  ;;  %v953_v42 = vpop.f32.mrb[17].mxu0 }
 0x368   : > { %v954_v43 = vadd.f32 %v2934_v39, %v953_v42 }
 0x369   : > { %v1033_v46 = vmax.f32 %v959_v41, 0.0 }
 0x36a   : > { %v1032_v44 = vmax.f32 %v954_v43, 0.0  ;;  %v1891_v45 = vpop.f32.mrb[18].mxu0 }
 0x36b   : > { %v969_v47 = vadd.f32 %v1891_v45, %v2934_v39  ;;  %v963_v48 = vpop.f32.mrb[19].mxu0 }
 0x36c   : > { %v964_v49 = vadd.f32 %v2934_v39, %v963_v48  ;;  %1942 = vmatprep.mubr.f32.mxu1 %v1032_v44 }
 0x36d   : > { %1943 = vmatmul.mubr.f32.vlgmr.msra.gmra.mrb[16].mxu1 %v1033_v46  ;;  %v1035_v52 = vmax.f32 %v969_v47, 0.0 }
 0x36e   : > { %v1034_v50 = vmax.f32 %v964_v49, 0.0  ;;  %v1894_v51 = vpop.f32.mrb[20].mxu0  ;;  %2190 = vmatpush3.bf16.msra.mxu1 %v2150_v21 }
 0x36f   : > { %v979_v53 = vadd.f32 %v1894_v51, %v2934_v39  ;;  %v973_v54 = vpop.f32.mrb[21].mxu0  ;;  %2183 = vmatprep.subr.bf16.mxu1 %v2154_v23 }
 0x370   : > { %v974_v55 = vadd.f32 %v2934_v39, %v973_v54  ;;  %1945 = vmatprep.mubr.f32.mxu1 %v1034_v50 }
 0x371   : > { %1946 = vmatmul.mubr.f32.gmra.mrb[18].mxu1 %v1035_v52  ;;  %v1037_v58 = vmax.f32 %v979_v53, 0.0 }
 0x372   : > { %v1036_v56 = vmax.f32 %v974_v55, 0.0  ;;  %v1897_v57 = vpop.f32.mrb[22].mxu0  ;;  %2191 = vmatpush3.bf16.msra.mxu1 %v2154_v23 }
 0x373   : > { %v989_v59 = vadd.f32 %v1897_v57, %v2934_v39  ;;  %v983_v60 = vpop.f32.mrb[23].mxu0  ;;  %2184 = vmatprep.subr.bf16.mxu1 %v2158_v26 }
 0x374   : > { %v984_v61 = vadd.f32 %v2934_v39, %v983_v60  ;;  %1948 = vmatprep.mubr.f32.mxu1 %v1036_v56 }
 0x375   : > { %1949 = vmatmul.mubr.f32.gmra.mrb[20].mxu1 %v1037_v58  ;;  %v1039_v0 = vmax.f32 %v989_v59, 0.0 }
 0x376   : > { %v1038_v62 = vmax.f32 %v984_v61, 0.0  ;;  %v1900_v63 = vpop.f32.mrb[24].mxu0  ;;  %2192 = vmatpush3.bf16.msra.mxu1 %v2158_v26  ;;  %v2178_v26 = vpack.c.bf16 %v1247_v25, %v1246_v24 }
 0x377   : > { %v999_v1 = vadd.f32 %v1900_v63, %v2934_v39  ;;  %v993_v2 = vpop.f32.mrb[25].mxu0  ;;  %2185 = vmatprep.subr.bf16.mxu1 %v2915_v29 }
 0x378   : > { %v994_v3 = vadd.f32 %v2934_v39, %v993_v2  ;;  %1951 = vmatprep.mubr.f32.mxu1 %v1038_v62  ;;  %2179 = vmatprep.subr.bf16.mxu0 %v2178_v26 }
 0x379   : > { %1952 = vmatmul.mubr.f32.gmra.mrb[22].mxu1 %v1039_v0  ;;  %v1041_v6 = vmax.f32 %v999_v1, 0.0  ;;  %2181 = vmatpush3.bf16.msra.mxu0 %v2178_v26 }
 0x37a   : > { %v1040_v4 = vmax.f32 %v994_v3, 0.0  ;;  %v1903_v5 = vpop.f32.mrb[26].mxu0  ;;  %2193 = vmatpush3.bf16.msra.mxu1 %v2915_v29 }
 0x37b   : > { %v1009_v7 = vadd.f32 %v1903_v5, %v2934_v39  ;;  %v1003_v8 = vpop.f32.mrb[27].mxu0  ;;  %2186 = vmatprep.subr.bf16.mxu1 %v2918_v32 }
 0x37c   : > { %v1004_v9 = vadd.f32 %v2934_v39, %v1003_v8  ;;  %1954 = vmatprep.mubr.f32.mxu1 %v1040_v4 }
 0x37d   : > { %1955 = vmatmul.mubr.f32.gmra.mrb[24].mxu1 %v1041_v6  ;;  %v1043_v12 = vmax.f32 %v1009_v7, 0.0 }
 0x37e   : > { %v1042_v10 = vmax.f32 %v1004_v9, 0.0  ;;  %v1906_v11 = vpop.f32.mrb[28].mxu0  ;;  %2194 = vmatpush3.bf16.msra.mxu1 %v2918_v32 }
 0x37f   : > { %v1019_v13 = vadd.f32 %v1906_v11, %v2934_v39  ;;  %v1013_v14 = vpop.f32.mrb[29].mxu0  ;;  %2187 = vmatprep.subr.bf16.mxu1 %v2922_v35 }
 0x380   : > { %v1014_v15 = vadd.f32 %v2934_v39, %v1013_v14  ;;  %1957 = vmatprep.mubr.f32.mxu1 %v1042_v10 }
 0x381   : > { %1958 = vmatmul.mubr.f32.gmra.mrb[26].mxu1 %v1043_v12  ;;  %v1045_v18 = vmax.f32 %v1019_v13, 0.0  ;;  %v1574_v12 = vld [vmem:[%s3076_s27] ss:$0 sm:$0xff] }
 0x382   : > { %v1044_v16 = vmax.f32 %v1014_v15, 0.0  ;;  %v1909_v17 = vpop.f32.mrb[30].mxu0  ;;  %2195 = vmatpush3.bf16.msra.mxu1 %v2922_v35 }
 0x383   : > { %v1029_v19 = vadd.f32 %v1909_v17, %v2934_v39  ;;  %v1023_v20 = vpop.f32.mrb[31].mxu0  ;;  %2188 = vmatprep.subr.bf16.mxu1 %v2926_v38 }
 0x384   : > { %v1024_v21 = vadd.f32 %v2934_v39, %v1023_v20  ;;  %1960 = vmatprep.mubr.f32.mxu1 %v1044_v16 }
 0x385   : > { %1961 = vmatmul.mubr.f32.gmra.mrb[28].mxu1 %v1045_v18  ;;  %v1047_v23 = vmax.f32 %v1029_v19, 0.0 }
 0x386   : > { %v1046_v22 = vmax.f32 %v1024_v21, 0.0  ;;  %2196 = vmatpush3.bf16.msra.mxu1 %v2926_v38 }
 0x387   : > { %2189 = vmatprep.subr.bf16.mxu1 %v2178_v26 }
 0x388   : > { %1963 = vmatprep.mubr.f32.mxu1 %v1046_v22 }
 0x389   : > { %1964 = vmatmul.mubr.f32.gmra.mrb[30].mxu1 %v1047_v23 }
 0x38a   : > { %2197 = vmatpush3.bf16.msra.mxu1 %v2178_v26 }
 0x440   : > { %v1944_v28 = vpop.f32.mrb[16].mxu1 }
 0x441   : > { %v1143_v29 = vadd.f32 %v1944_v28, %v1573_v27  ;;  %v1137_v30 = vpop.f32.mrb[17].mxu1 }
 0x442   : > { %v1138_v31 = vadd.f32 %v1573_v27, %v1137_v30 }
 0x443   : > { %v1217_v34 = vmax.f32 %v1143_v29, 0.0 }
 0x444   : > { %v1216_v32 = vmax.f32 %v1138_v31, 0.0  ;;  %v1947_v33 = vpop.f32.mrb[18].mxu1 }
 0x445   : > { %v1153_v35 = vadd.f32 %v1947_v33, %v1573_v27  ;;  %v1147_v36 = vpop.f32.mrb[19].mxu1 }
 0x446   : > { %v1148_v37 = vadd.f32 %v1573_v27, %v1147_v36  ;;  %1998 = vmatprep.mubr.f32.mxu0 %v1216_v32 }
 0x447   : > { %1999 = vmatmul.mubr.f32.vlgmr.msra.gmra.mrb[32].mxu0 %v1217_v34  ;;  %v1219_v40 = vmax.f32 %v1153_v35, 0.0 }
 0x448   : > { %v1218_v38 = vmax.f32 %v1148_v37, 0.0  ;;  %v1950_v39 = vpop.f32.mrb[20].mxu1 }
 0x449   : > { %v1163_v41 = vadd.f32 %v1950_v39, %v1573_v27  ;;  %v1157_v42 = vpop.f32.mrb[21].mxu1 }
 0x44a   : > { %v1158_v43 = vadd.f32 %v1573_v27, %v1157_v42  ;;  %2001 = vmatprep.mubr.f32.mxu0 %v1218_v38 }
 0x44b   : > { %2002 = vmatmul.mubr.f32.gmra.mrb[34].mxu0 %v1219_v40  ;;  %v1221_v46 = vmax.f32 %v1163_v41, 0.0 }
 0x44c   : > { %v1220_v44 = vmax.f32 %v1158_v43, 0.0  ;;  %v1953_v45 = vpop.f32.mrb[22].mxu1 }
 0x44d   : > { %v1173_v47 = vadd.f32 %v1953_v45, %v1573_v27  ;;  %v1167_v48 = vpop.f32.mrb[23].mxu1 }
 0x44e   : > { %v1168_v49 = vadd.f32 %v1573_v27, %v1167_v48  ;;  %2004 = vmatprep.mubr.f32.mxu0 %v1220_v44 }
 0x44f   : > { %2005 = vmatmul.mubr.f32.gmra.mrb[36].mxu0 %v1221_v46  ;;  %v1223_v52 = vmax.f32 %v1173_v47, 0.0 }
 0x450   : > { %v1222_v50 = vmax.f32 %v1168_v49, 0.0  ;;  %v1956_v51 = vpop.f32.mrb[24].mxu1 }
 0x451   : > { %v1183_v53 = vadd.f32 %v1956_v51, %v1573_v27  ;;  %v1177_v54 = vpop.f32.mrb[25].mxu1 }
 0x452   : > { %v1178_v55 = vadd.f32 %v1573_v27, %v1177_v54  ;;  %2007 = vmatprep.mubr.f32.mxu0 %v1222_v50 }
 0x453   : > { %2008 = vmatmul.mubr.f32.gmra.mrb[38].mxu0 %v1223_v52  ;;  %v1225_v58 = vmax.f32 %v1183_v53, 0.0 }
 0x454   : > { %v1224_v56 = vmax.f32 %v1178_v55, 0.0  ;;  %v1959_v57 = vpop.f32.mrb[26].mxu1 }
 0x455   : > { %v1193_v59 = vadd.f32 %v1959_v57, %v1573_v27  ;;  %v1187_v60 = vpop.f32.mrb[27].mxu1 }
 0x456   : > { %v1188_v61 = vadd.f32 %v1573_v27, %v1187_v60  ;;  %2010 = vmatprep.mubr.f32.mxu1 %v1224_v56 }
 0x457   : > { %2011 = vmatmul.mubr.f32.vlgmr.msra.gmra.mrb[32].mxu1 %v1225_v58  ;;  %v1227_v0 = vmax.f32 %v1193_v59, 0.0 }
 0x458   : > { %v1226_v62 = vmax.f32 %v1188_v61, 0.0  ;;  %v1962_v63 = vpop.f32.mrb[28].mxu1 }
 0x459   : > { %v1203_v1 = vadd.f32 %v1962_v63, %v1573_v27  ;;  %v1197_v2 = vpop.f32.mrb[29].mxu1 }
 0x45a   : > { %v1198_v3 = vadd.f32 %v1573_v27, %v1197_v2  ;;  %2013 = vmatprep.mubr.f32.mxu1 %v1226_v62 }
 0x45b   : > { %2014 = vmatmul.mubr.f32.gmra.mrb[34].mxu1 %v1227_v0  ;;  %v1229_v6 = vmax.f32 %v1203_v1, 0.0 }
 0x45c   : > { %v1228_v4 = vmax.f32 %v1198_v3, 0.0  ;;  %v1965_v5 = vpop.f32.mrb[30].mxu1 }
 0x45d   : > { %v1213_v7 = vadd.f32 %v1965_v5, %v1573_v27  ;;  %v1207_v8 = vpop.f32.mrb[31].mxu1 }
 0x45e   : > { %v1208_v9 = vadd.f32 %v1573_v27, %v1207_v8  ;;  %2016 = vmatprep.mubr.f32.mxu1 %v1228_v4 }
 0x45f   : > { %2017 = vmatmul.mubr.f32.gmra.mrb[36].mxu1 %v1229_v6  ;;  %v1231_v11 = vmax.f32 %v1213_v7, 0.0 }
 0x460   : > { %v1230_v10 = vmax.f32 %v1208_v9, 0.0 }
 0x462   : > { %2019 = vmatprep.mubr.f32.mxu1 %v1230_v10 }
 0x463   : > { %2020 = vmatmul.mubr.f32.gmra.mrb[38].mxu1 %v1231_v11 }
 0x51a   : > { %v2000_v13 = vpop.f32.mrb[32].mxu0 }
 0x51b   : > { %v1327_v14 = vadd.f32 %v2000_v13, %v1574_v12  ;;  %v1321_v15 = vpop.f32.mrb[33].mxu0 }
 0x51c   : > { %v1322_v16 = vadd.f32 %v1574_v12, %v1321_v15 }
 0x51d   : > { %1401 = vst [vmem:[%s2968_s24 + $0x8] sm:$0xff] %v1327_v14 }
 0x51e   : > { %1400 = vst [vmem:[%s2968_s24] sm:$0xff] %v1322_v16  ;;  %v2003_v17 = vpop.f32.mrb[34].mxu0 }
 0x51f   : > { %v1337_v18 = vadd.f32 %v2003_v17, %v1574_v12  ;;  %v1331_v19 = vpop.f32.mrb[35].mxu0 }
 0x520   : > { %v1332_v20 = vadd.f32 %v1574_v12, %v1331_v19 }
 0x521   : > { %1403 = vst [vmem:[%s2968_s24 + $0x18] sm:$0xff] %v1337_v18 }
 0x522   : > { %1402 = vst [vmem:[%s2968_s24 + $0x10] sm:$0xff] %v1332_v20  ;;  %v2006_v21 = vpop.f32.mrb[36].mxu0 }
 0x523   : > { %v1347_v22 = vadd.f32 %v2006_v21, %v1574_v12  ;;  %v1341_v23 = vpop.f32.mrb[37].mxu0 }
 0x524   : > { %v1342_v24 = vadd.f32 %v1574_v12, %v1341_v23 }
 0x525   : > { %1405 = vst [vmem:[%s2968_s24 + $0x28] sm:$0xff] %v1347_v22 }
 0x526   : > { %1404 = vst [vmem:[%s2968_s24 + $0x20] sm:$0xff] %v1342_v24  ;;  %v2009_v25 = vpop.f32.mrb[38].mxu0 }
 0x527   : > { %v1357_v26 = vadd.f32 %v2009_v25, %v1574_v12  ;;  %v1351_v27 = vpop.f32.mrb[39].mxu0 }
 0x528   : > { %v1352_v28 = vadd.f32 %v1574_v12, %v1351_v27 }
 0x529   : > { %1407 = vst [vmem:[%s2968_s24 + $0x38] sm:$0xff] %v1357_v26 }
 0x52a   : > { %1406 = vst [vmem:[%s2968_s24 + $0x30] sm:$0xff] %v1352_v28  ;;  %v2012_v29 = vpop.f32.mrb[32].mxu1 }
 0x52b   : > { %v1367_v30 = vadd.f32 %v2012_v29, %v1574_v12  ;;  %v1361_v31 = vpop.f32.mrb[33].mxu1 }
 0x52c   : > { %v1362_v32 = vadd.f32 %v1574_v12, %v1361_v31 }
 0x52d   : > { %1409 = vst [vmem:[%s2968_s24 + $0x48] sm:$0xff] %v1367_v30 }
 0x52e   : > { %1408 = vst [vmem:[%s2968_s24 + $0x40] sm:$0xff] %v1362_v32  ;;  %v2015_v33 = vpop.f32.mrb[34].mxu1 }
 0x52f   : > { %v1377_v34 = vadd.f32 %v2015_v33, %v1574_v12  ;;  %v1371_v35 = vpop.f32.mrb[35].mxu1 }
 0x530   : > { %v1372_v36 = vadd.f32 %v1574_v12, %v1371_v35 }
 0x531   : > { %1411 = vst [vmem:[%s2968_s24 + $0x58] sm:$0xff] %v1377_v34 }
 0x532   : > { %1410 = vst [vmem:[%s2968_s24 + $0x50] sm:$0xff] %v1372_v36  ;;  %v2018_v37 = vpop.f32.mrb[36].mxu1 }
 0x533   : > { %v1387_v38 = vadd.f32 %v2018_v37, %v1574_v12  ;;  %v1381_v39 = vpop.f32.mrb[37].mxu1 }
 0x534   : > { %v1382_v40 = vadd.f32 %v1574_v12, %v1381_v39 }
 0x535   : > { %1413 = vst [vmem:[%s2968_s24 + $0x68] sm:$0xff] %v1387_v38 }
 0x536   : > { %1412 = vst [vmem:[%s2968_s24 + $0x60] sm:$0xff] %v1382_v40  ;;  %v2021_v41 = vpop.f32.mrb[38].mxu1 }
 0x537   : > { %v1397_v42 = vadd.f32 %v2021_v41, %v1574_v12  ;;  %v1391_v43 = vpop.f32.mrb[39].mxu1 }
 0x538   : > { %v1392_v44 = vadd.f32 %v1574_v12, %v1391_v43 }
 0x539   : > { %1415 = vst [vmem:[%s2968_s24 + $0x78] sm:$0xff] %v1397_v42 }
 0x53a   : > { %1414 = vst [vmem:[%s2968_s24 + $0x70] sm:$0xff] %v1392_v44 }
 0x53b   : > { %2482 = shalt.err (!%p2479_p8)
}
 0x53c   : > { %s2483_s15 = scalar_lea.hbm %s2989_s8, 2048  ;;  %s2487_s29 = scalar_lea.hbm %s3077_s1, 4096 }
 0x53d   : > { %p2484_p6 = scmp.ne.s32.totalorder %s2989_s8, %s2483_s15  ;;  %p2488_p3 = scmp.lt.u32.totalorder %s2989_s8, %s3077_s1 }
 0x53e   : > { %p2489_p5 = scmp.lt.u32.totalorder %s2487_s29, %s2483_s15  ;;  %p2491_p7 = scmp.lt.u32.totalorder %s2483_s15, %s2989_s8 }
 0x53f   : > { %p2485_p10 = pnand %p2484_p6, %p3078_p4 }
 0x540   : > { %p2490_p9 = por %p2489_p5, %p2488_p3 }
 0x541   : > { %p2486_p11 = pneg %p2485_p10 }
 0x542   : > { %p2492_p12 = por %p2491_p7, %p2490_p9 }
 0x544   : > { %p2493_p1 = pnand %p2492_p12, %p2486_p11 }
 0x546   : > { %2496 = shalt.err (!%p2493_p1)
}
 0x547   : > { %s2558_s25 = smov 128   ;;  %s2559_s28 = smov 8  }
 0x548   : > { %2220 = dma.vmem_to_hbm [thread:$0]  (%p3078_p4), %s2991_s12, 2048, %s2989_s8, %s1417_s23, %s2558_s25, %s2558_s25, %s2559_s28  }
 0x549 PF: > { %s1445_s22 = sand.u32 1, %s2535_s17   ;;  %p3079_p13 = scmp.ne.s32.totalorder %s3065_s21, 0 }
 0x54a   : > { %p3080_p0 = scmp.ge.s32.totalorder %s2547_s20, 2  ;;  %s1446_s30 = scalar_lea.sflag [#allocation4], %s1445_s22 }
 0x54c   : > { %p2243_p2 = pnand %p3080_p0, %p3079_p13 }
 0x54e   : > { %2530 = dma.done.wait (!%p2243_p2), %s1446_s30, 2048  }
 0x54f   : > { %2532 = vsyncadd (!%p2243_p2), %s1446_s30, 4294965248  ;;  %p27_p8 = scmp.ge.s32.totalorder %s2793_s16, 4   ;;  %s3081_s17 = smov %s2539_s18 }
 0x550   : > { %s3082_s18 = smov %s2543_s19  ;;  %s3083_s19 = smov %s2805_s10 }
 0x551   : > { %s3084_s20 = smov %s2793_s16  ;;  %29 = sbr.rel (!%p27_p8) target bundleno = 13 (0xd), region = 129 }
 0x558   :  { %1451 = vsyncpa [#allocation3], 1 }
 0x559   :  { %1453 = vsyncpa [#allocation3 + $0x1], 1 }
 0x55a   :  { %1454 = vsyncpa [#allocation6], 1 }
 0x55b   :  { %1455 = vsyncpa [#allocation9], 1 }
 0x55c   :  { %1456 = vsyncpa [#allocation12], 1 }
 0x55d   :  { %1457 = vsyncpa [#allocation4], 1 }
 0x55e   :  { %1459 = vsyncpa [#allocation4 + $0x1], 1 }

</bundles_post_ra>
